<compile_context>
chip_gen: v7x
topology: tpu7x:2x2x1
jax: 0.10.0
libtpu: 0.0.40
codegen_flags: <defaults>
</compile_context>

<pallas_src>
import functools

import jax
import jax.numpy as jnp
from jax.experimental import pallas as pl
from jax.experimental.pallas import tpu as pltpu

_BN_EPS = 1e-5


def _leaky_relu(x, slope):
    return jnp.where(x >= 0, x, slope * x)


def _round_up(x, m):
    return (x + m - 1) // m * m


def skipconn_kernel(x_ref, w_ref, b_ref, wo_ref, bo_ref, y_ref, buf_ref,
                    *, leaky_slope):
    """One batch tile: x (I, TB) -> y (1, TB), batch on the lane axis."""
    n_layers = w_ref.shape[0]          # L + 1  (inLayer + L hidden layers)
    H = w_ref.shape[1]                 # hidden size
    I = x_ref.shape[0]                 # init (input) size
    cdt = buf_ref.dtype                # MXU operand dtype (f32 or bf16)

    # Reset the persistent cat buffer (cheap: KPAD*TB/1024 vreg stores) and
    # drop this tile's x into its fixed region.  Regions: [0:H)=cur,
    # [H:2H)=prev, [2H:2H+I)=x, [2H+I:KPAD)=0.  Zero-padded weight columns make
    # the cur/prev regions harmless for the first two layers.
    buf_ref[...] = jnp.zeros_like(buf_ref)
    buf_ref[2 * H:2 * H + I, :] = x_ref[...].astype(cdt)

    # inLayer + hidden layers: each is ONE MXU matmul against the full KPAD-row
    # cat buffer (K padded to 128 costs no extra lane occupancy), then a
    # lane-dense bias + LeakyReLU on the VPU.  Dropout(eval) = identity.
    cur = None
    for l in range(n_layers):
        z = jnp.dot(w_ref[l], buf_ref[...],
                    preferred_element_type=jnp.float32)      # (H, TB) f32
        new_cur = _leaky_relu(z + b_ref[l], leaky_slope).astype(cdt)
        if l > 0:
            buf_ref[H:2 * H, :] = cur                         # prev <- cur
        buf_ref[0:H, :] = new_cur                             # cur  <- new
        cur = new_cur

    # outLayer (N=1) on the VPU/XLU: sublane-weighted reduce over the cat
    # buffer (zero-padded wo kills the pad rows), then tanh -> [0, 1].
    hcat = buf_ref[...].astype(jnp.float32)                   # (KPAD, TB)
    y = jnp.sum(hcat * wo_ref[...], axis=0, keepdims=True) + bo_ref[...]
    y_ref[...] = (jnp.tanh(y) + 1.0) * 0.5


def skipconn_forward(x, kp, *, leaky_slope=0.01, block_b=1024):
    """x: (B, init_size) float32.  kp: folded params from fold_params()."""
    B, I = x.shape
    x = x.astype(jnp.float32)
    w_all, b_all, wo, bo = kp["w_all"], kp["b_all"], kp["wo"], kp["bo"]
    KPAD = wo.shape[0]
    assert w_all.shape[2] == KPAD

    # Batch tile on the lane axis: multiple of 128 lanes; pad B to full tiles.
    # (On v7x, pick block_b so the grid has >= 4 steps when B allows, to keep
    #  both TensorCores busy; keep TB >= 1024 when the batch is large.)
    TB = _round_up(min(block_b, max(B, 1)), 128)
    B_pad = _round_up(B, TB)
    x_t = jnp.pad(x, ((0, B_pad - B), (0, 0))).T               # (I, B_pad)

    kernel = functools.partial(skipconn_kernel, leaky_slope=leaky_slope)
    y = pl.pallas_call(
        kernel,
        out_shape=jax.ShapeDtypeStruct((1, B_pad), jnp.float32),
        grid=(B_pad // TB,),
        in_specs=[
            pl.BlockSpec((I, TB), lambda i: (0, i)),           # lane-dense x
            pl.BlockSpec(w_all.shape, lambda i: (0, 0, 0)),    # VMEM-resident
            pl.BlockSpec(b_all.shape, lambda i: (0, 0, 0)),
            pl.BlockSpec(wo.shape, lambda i: (0, 0)),
            pl.BlockSpec(bo.shape, lambda i: (0, 0)),
        ],
        out_specs=pl.BlockSpec((1, TB), lambda i: (0, i)),     # lane-dense y
        scratch_shapes=[pltpu.VMEM((KPAD, TB), w_all.dtype)],  # cat buffer
        compiler_params=pltpu.CompilerParams(
            dimension_semantics=("parallel",)),
    )(x_t, w_all, b_all, wo, bo)
    return y[0, :B].reshape(B, 1)


def make_raw_params(key, *, init_size, hidden_size, num_hidden_layers):
    """Deterministic synthetic parameters in torch layout (un-folded)."""
    I, H, L = init_size, hidden_size, num_hidden_layers
    keys = jax.random.split(key, 4)

    def lin(k, fan_in, fan_out):
        bound = 1.0 / jnp.sqrt(fan_in)
        kw, kb = jax.random.split(k)
        w = jax.random.uniform(kw, (fan_in, fan_out), jnp.float32, -bound, bound)
        b = jax.random.uniform(kb, (1, fan_out), jnp.float32, -bound, bound)
        return w, b

    def bn(k, n):
        kg, kb, km, kv = jax.random.split(k, 4)
        return dict(
            gamma=1.0 + 0.1 * jax.random.normal(kg, (1, n), jnp.float32),
            beta=0.1 * jax.random.normal(kb, (1, n), jnp.float32),
            mean=0.1 * jax.random.normal(km, (1, n), jnp.float32),
            var=0.5 + jnp.abs(jax.random.normal(kv, (1, n), jnp.float32)),
        )

    w, b = lin(keys[0], I, H)
    raw = {"in": dict(w=w, b=b, **bn(keys[1], H)), "hidden": []}
    for l in range(L):
        in_size = H + I if l == 0 else 2 * H + I
        w, b = lin(jax.random.fold_in(keys[2], l), in_size, H)
        raw["hidden"].append(
            dict(w=w, b=b, **bn(jax.random.fold_in(keys[3], l), H)))
    wo, bo = lin(jax.random.fold_in(keys[0], 999), 2 * H + I, 1)
    raw["out"] = dict(w=wo, b=bo)
    return raw


def fold_params(raw, *, compute_dtype=jnp.float32):
    """Fold BN(eval)+bias into weights; transpose + zero-pad to the kernel layout.

    Returns:
      w_all: (L+1, H, KPAD)  compute_dtype   unified [inLayer, hidden...] weights
      b_all: (L+1, H, 1)     float32         folded biases (column vectors)
      wo:    (KPAD, 1)       float32         out-layer weight column (zero padded)
      bo:    (1, 1)          float32         out-layer bias
    """
    I, H = raw["in"]["w"].shape
    L = len(raw["hidden"])
    assert L >= 1
    KPAD = _round_up(2 * H + I, 128)

    def fold(layer):
        scale = layer["gamma"] / jnp.sqrt(layer["var"] + _BN_EPS)     # (1, H)
        shift = layer["beta"] - layer["mean"] * scale
        w_t = (layer["w"] * scale).T                                  # (H, fan_in)
        b_t = (layer["b"] * scale + shift).T                          # (H, 1)
        return w_t, b_t

    w_all = jnp.zeros((L + 1, H, KPAD), jnp.float32)
    b_all = jnp.zeros((L + 1, H, 1), jnp.float32)

    # inLayer: only the x columns [2H:2H+I) are non-zero.
    w_t, b_t = fold(raw["in"])                                        # (H, I)
    w_all = w_all.at[0, :, 2 * H:2 * H + I].set(w_t)
    b_all = b_all.at[0].set(b_t)

    # hidden[0]: torch weight rows are [cur (H), x (I)] — prev columns stay 0.
    w_t, b_t = fold(raw["hidden"][0])                                 # (H, H+I)
    w_all = w_all.at[1, :, 0:H].set(w_t[:, :H])
    w_all = w_all.at[1, :, 2 * H:2 * H + I].set(w_t[:, H:])
    b_all = b_all.at[1].set(b_t)

    # hidden[1:]: torch weight rows are [cur (H), prev (H), x (I)].
    for l in range(1, L):
        w_t, b_t = fold(raw["hidden"][l])                             # (H, 2H+I)
        w_all = w_all.at[l + 1, :, 0:2 * H + I].set(w_t)
        b_all = b_all.at[l + 1].set(b_t)

    wo = jnp.zeros((KPAD, 1), jnp.float32).at[0:2 * H + I, :].set(raw["out"]["w"])
    return dict(w_all=w_all.astype(compute_dtype), b_all=b_all,
                wo=wo, bo=raw["out"]["b"].astype(jnp.float32))


def skipconn_reference(x, raw, *, leaky_slope=0.01):
    """Plain-JAX reference mirroring the PyTorch forward (eval mode)."""
    def bn(h, p):
        return (h - p["mean"]) / jnp.sqrt(p["var"] + _BN_EPS) * p["gamma"] + p["beta"]

    def leaky(v):
        return jnp.where(v >= 0, v, leaky_slope * v)

    cur = leaky(bn(x @ raw["in"]["w"] + raw["in"]["b"], raw["in"]))
    prev = jnp.zeros((x.shape[0], 0), x.dtype)          # torch.empty(B, 0)
    for lp in raw["hidden"]:
        comb = jnp.concatenate([cur, prev, x], axis=1)
        prev, cur = cur, leaky(bn(comb @ lp["w"] + lp["b"], lp))
    y = jnp.concatenate([cur, prev, x], axis=1) @ raw["out"]["w"] + raw["out"]["b"]
    return (jnp.tanh(y) + 1.0) / 2.0


if __name__ == "__main__":
    INIT_SIZE, HIDDEN, LAYERS, LEAKY = 2, 32, 3, 0.01
    key = jax.random.PRNGKey(0)
    kx, kp, kx2 = jax.random.split(key, 3)
    raw = make_raw_params(kp, init_size=INIT_SIZE, hidden_size=HIDDEN,
                          num_hidden_layers=LAYERS)

    # --- small batch, single grid step, strict f32 check ---------------------
    x = jax.random.normal(kx, (8, INIT_SIZE), jnp.float32)
    params_f32 = fold_params(raw, compute_dtype=jnp.float32)
    out = jax.block_until_ready(
        skipconn_forward(x, params_f32, leaky_slope=LEAKY))
    ref = skipconn_reference(x, raw, leaky_slope=LEAKY)
    assert out.shape == (8, 1)
    assert jnp.all(jnp.isfinite(out))
    assert jnp.allclose(out, ref, atol=2e-4, rtol=2e-4), \
        float(jnp.max(jnp.abs(out - ref)))

    # --- larger ragged batch: multi-step grid + padding path ------------------
    xb = jax.random.normal(kx2, (1000, INIT_SIZE), jnp.float32)
    outb = jax.block_until_ready(
        skipconn_forward(xb, params_f32, leaky_slope=LEAKY, block_b=256))
    refb = skipconn_reference(xb, raw, leaky_slope=LEAKY)
    assert outb.shape == (1000, 1)
    assert jnp.allclose(outb, refb, atol=2e-4, rtol=2e-4), \
        float(jnp.max(jnp.abs(outb - refb)))

    # --- bf16 MXU operands (fast path on all generations), f32 accumulation ---
    params_bf16 = fold_params(raw, compute_dtype=jnp.bfloat16)
    outh = jax.block_until_ready(
        skipconn_forward(xb, params_bf16, leaky_slope=LEAKY, block_b=256))
    assert jnp.all(jnp.isfinite(outh))
    assert float(jnp.max(jnp.abs(outh - refb))) < 0.1

    print("KERNEL_OK")
</pallas_src>

<mosaic_0001>
module attributes {stable_mosaic.version = 11 : i64} {
  func.func @skipconn_kernel(%arg0: i32, %arg1: memref<2x128xf32, #tpu.memory_space<vmem>>, %arg2: memref<4x32x128xf32, #tpu.memory_space<vmem>>, %arg3: memref<4x32x1xf32, #tpu.memory_space<vmem>>, %arg4: memref<128x1xf32, #tpu.memory_space<vmem>>, %arg5: memref<1x1xf32, #tpu.memory_space<vmem>>, %arg6: memref<1x128xf32, #tpu.memory_space<vmem>>, %arg7: memref<128x128xf32, #tpu.memory_space<vmem>>) attributes {dimension_semantics = [#tpu.dimension_semantics<parallel>], iteration_bounds = array<i64: 1>, scalar_prefetch = 0 : i64, scratch_operands = 1 : i64, tpu.core_type = #tpu.core_type<tc>, window_params = [{transform_indices = @transform_0, window_bounds = array<i64: 2, 128>}, {pipeline_mode = #tpu.pipeline_mode<synchronous>, transform_indices = @transform_1, window_bounds = array<i64: 4, 32, 128>}, {pipeline_mode = #tpu.pipeline_mode<synchronous>, transform_indices = @transform_2, window_bounds = array<i64: 4, 32, 1>}, {pipeline_mode = #tpu.pipeline_mode<synchronous>, transform_indices = @transform_3, window_bounds = array<i64: 128, 1>}, {pipeline_mode = #tpu.pipeline_mode<synchronous>, transform_indices = @transform_4, window_bounds = array<i64: 1, 1>}, {transform_indices = @transform_5, window_bounds = array<i64: 1, 128>}]} {
    %cst = arith.constant 0.000000e+00 : f32
    %0 = vector.broadcast %cst : f32 to vector<128x128xf32>
    %c0 = arith.constant 0 : index
    %c0_0 = arith.constant 0 : index
    %1 = vector.load %arg7[%c0, %c0_0] : memref<128x128xf32, #tpu.memory_space<vmem>>, vector<128x128xf32>
    tpu.vector_store %arg7[%c0, %c0_0], %0 {strides = array<i32>} : memref<128x128xf32, #tpu.memory_space<vmem>>, vector<128x128xf32>,
    %c0_1 = arith.constant 0 : index
    %c0_2 = arith.constant 0 : index
    %2 = vector.load %arg1[%c0_1, %c0_2] : memref<2x128xf32, #tpu.memory_space<vmem>>, vector<2x128xf32>
    %c64 = arith.constant 64 : index
    %c0_3 = arith.constant 0 : index
    %3 = vector.load %arg7[%c64, %c0_3] : memref<128x128xf32, #tpu.memory_space<vmem>>, vector<2x128xf32>
    tpu.vector_store %arg7[%c64, %c0_3], %2 {strides = array<i32>} : memref<128x128xf32, #tpu.memory_space<vmem>>, vector<2x128xf32>,
    %c0_4 = arith.constant 0 : index
    %c0_5 = arith.constant 0 : index
    %c0_6 = arith.constant 0 : index
    %4 = vector.load %arg2[%c0_4, %c0_5, %c0_6] : memref<4x32x128xf32, #tpu.memory_space<vmem>>, vector<1x32x128xf32>
    %5 = vector.shape_cast %4 : vector<1x32x128xf32> to vector<32x128xf32>
    %c0_7 = arith.constant 0 : index
    %c0_8 = arith.constant 0 : index
    %6 = vector.load %arg7[%c0_7, %c0_8] : memref<128x128xf32, #tpu.memory_space<vmem>>, vector<128x128xf32>
    %cst_9 = arith.constant dense<0.000000e+00> : vector<32x128xf32>
    %7 = tpu.matmul %5, %6, %cst_9 {dimension_numbers = #tpu.dot_dimension_numbers<[1], [0], [0], [1], [0, 0, 1, 1], [], []>} : vector<32x128xf32>, vector<128x128xf32>, vector<32x128xf32> -> vector<32x128xf32>
    %c0_10 = arith.constant 0 : index
    %c0_11 = arith.constant 0 : index
    %c0_12 = arith.constant 0 : index
    %8 = vector.load %arg3[%c0_10, %c0_11, %c0_12] : memref<4x32x1xf32, #tpu.memory_space<vmem>>, vector<1x32x1xf32>
    %9 = vector.shape_cast %8 : vector<1x32x1xf32> to vector<32x1xf32>
    %10 = vector.broadcast %9 : vector<32x1xf32> to vector<32x128xf32>
    %11 = arith.addf %7, %10 : vector<32x128xf32>
    %cst_13 = arith.constant 0.000000e+00 : f32
    %12 = vector.broadcast %cst_13 : f32 to vector<32x128xf32>
    %13 = arith.cmpf oge, %11, %12 : vector<32x128xf32>
    %cst_14 = arith.constant 0.00999999977 : f32
    %14 = vector.broadcast %cst_14 : f32 to vector<32x128xf32>
    %15 = arith.mulf %14, %11 : vector<32x128xf32>
    %16 = arith.select %13, %11, %15 : vector<32x128xi1>, vector<32x128xf32>
    %c0_15 = arith.constant 0 : index
    %c0_16 = arith.constant 0 : index
    %17 = vector.load %arg7[%c0_15, %c0_16] : memref<128x128xf32, #tpu.memory_space<vmem>>, vector<32x128xf32>
    tpu.vector_store %arg7[%c0_15, %c0_16], %16 {strides = array<i32>} : memref<128x128xf32, #tpu.memory_space<vmem>>, vector<32x128xf32>,
    %c1 = arith.constant 1 : index
    %c0_17 = arith.constant 0 : index
    %c0_18 = arith.constant 0 : index
    %18 = vector.load %arg2[%c1, %c0_17, %c0_18] : memref<4x32x128xf32, #tpu.memory_space<vmem>>, vector<1x32x128xf32>
    %19 = vector.shape_cast %18 : vector<1x32x128xf32> to vector<32x128xf32>
    %c0_19 = arith.constant 0 : index
    %c0_20 = arith.constant 0 : index
    %20 = vector.load %arg7[%c0_19, %c0_20] : memref<128x128xf32, #tpu.memory_space<vmem>>, vector<128x128xf32>
    %cst_21 = arith.constant dense<0.000000e+00> : vector<32x128xf32>
    %21 = tpu.matmul %19, %20, %cst_21 {dimension_numbers = #tpu.dot_dimension_numbers<[1], [0], [0], [1], [0, 0, 1, 1], [], []>} : vector<32x128xf32>, vector<128x128xf32>, vector<32x128xf32> -> vector<32x128xf32>
    %c1_22 = arith.constant 1 : index
    %c0_23 = arith.constant 0 : index
    %c0_24 = arith.constant 0 : index
    %22 = vector.load %arg3[%c1_22, %c0_23, %c0_24] : memref<4x32x1xf32, #tpu.memory_space<vmem>>, vector<1x32x1xf32>
    %23 = vector.shape_cast %22 : vector<1x32x1xf32> to vector<32x1xf32>
    %24 = vector.broadcast %23 : vector<32x1xf32> to vector<32x128xf32>
    %25 = arith.addf %21, %24 : vector<32x128xf32>
    %cst_25 = arith.constant 0.000000e+00 : f32
    %26 = vector.broadcast %cst_25 : f32 to vector<32x128xf32>
    %27 = arith.cmpf oge, %25, %26 : vector<32x128xf32>
    %cst_26 = arith.constant 0.00999999977 : f32
    %28 = vector.broadcast %cst_26 : f32 to vector<32x128xf32>
    %29 = arith.mulf %28, %25 : vector<32x128xf32>
    %30 = arith.select %27, %25, %29 : vector<32x128xi1>, vector<32x128xf32>
    %c32 = arith.constant 32 : index
    %c0_27 = arith.constant 0 : index
    %31 = vector.load %arg7[%c32, %c0_27] : memref<128x128xf32, #tpu.memory_space<vmem>>, vector<32x128xf32>
    tpu.vector_store %arg7[%c32, %c0_27], %16 {strides = array<i32>} : memref<128x128xf32, #tpu.memory_space<vmem>>, vector<32x128xf32>,
    %c0_28 = arith.constant 0 : index
    %c0_29 = arith.constant 0 : index
    %32 = vector.load %arg7[%c0_28, %c0_29] : memref<128x128xf32, #tpu.memory_space<vmem>>, vector<32x128xf32>
    tpu.vector_store %arg7[%c0_28, %c0_29], %30 {strides = array<i32>} : memref<128x128xf32, #tpu.memory_space<vmem>>, vector<32x128xf32>,
    %c2 = arith.constant 2 : index
    %c0_30 = arith.constant 0 : index
    %c0_31 = arith.constant 0 : index
    %33 = vector.load %arg2[%c2, %c0_30, %c0_31] : memref<4x32x128xf32, #tpu.memory_space<vmem>>, vector<1x32x128xf32>
    %34 = vector.shape_cast %33 : vector<1x32x128xf32> to vector<32x128xf32>
    %c0_32 = arith.constant 0 : index
    %c0_33 = arith.constant 0 : index
    %35 = vector.load %arg7[%c0_32, %c0_33] : memref<128x128xf32, #tpu.memory_space<vmem>>, vector<128x128xf32>
    %cst_34 = arith.constant dense<0.000000e+00> : vector<32x128xf32>
    %36 = tpu.matmul %34, %35, %cst_34 {dimension_numbers = #tpu.dot_dimension_numbers<[1], [0], [0], [1], [0, 0, 1, 1], [], []>} : vector<32x128xf32>, vector<128x128xf32>, vector<32x128xf32> -> vector<32x128xf32>
    %c2_35 = arith.constant 2 : index
    %c0_36 = arith.constant 0 : index
    %c0_37 = arith.constant 0 : index
    %37 = vector.load %arg3[%c2_35, %c0_36, %c0_37] : memref<4x32x1xf32, #tpu.memory_space<vmem>>, vector<1x32x1xf32>
    %38 = vector.shape_cast %37 : vector<1x32x1xf32> to vector<32x1xf32>
    %39 = vector.broadcast %38 : vector<32x1xf32> to vector<32x128xf32>
    %40 = arith.addf %36, %39 : vector<32x128xf32>
    %cst_38 = arith.constant 0.000000e+00 : f32
    %41 = vector.broadcast %cst_38 : f32 to vector<32x128xf32>
    %42 = arith.cmpf oge, %40, %41 : vector<32x128xf32>
    %cst_39 = arith.constant 0.00999999977 : f32
    %43 = vector.broadcast %cst_39 : f32 to vector<32x128xf32>
    %44 = arith.mulf %43, %40 : vector<32x128xf32>
    %45 = arith.select %42, %40, %44 : vector<32x128xi1>, vector<32x128xf32>
    %c32_40 = arith.constant 32 : index
    %c0_41 = arith.constant 0 : index
    %46 = vector.load %arg7[%c32_40, %c0_41] : memref<128x128xf32, #tpu.memory_space<vmem>>, vector<32x128xf32>
    tpu.vector_store %arg7[%c32_40, %c0_41], %30 {strides = array<i32>} : memref<128x128xf32, #tpu.memory_space<vmem>>, vector<32x128xf32>,
    %c0_42 = arith.constant 0 : index
    %c0_43 = arith.constant 0 : index
    %47 = vector.load %arg7[%c0_42, %c0_43] : memref<128x128xf32, #tpu.memory_space<vmem>>, vector<32x128xf32>
    tpu.vector_store %arg7[%c0_42, %c0_43], %45 {strides = array<i32>} : memref<128x128xf32, #tpu.memory_space<vmem>>, vector<32x128xf32>,
    %c3 = arith.constant 3 : index
    %c0_44 = arith.constant 0 : index
    %c0_45 = arith.constant 0 : index
    %48 = vector.load %arg2[%c3, %c0_44, %c0_45] : memref<4x32x128xf32, #tpu.memory_space<vmem>>, vector<1x32x128xf32>
    %49 = vector.shape_cast %48 : vector<1x32x128xf32> to vector<32x128xf32>
    %c0_46 = arith.constant 0 : index
    %c0_47 = arith.constant 0 : index
    %50 = vector.load %arg7[%c0_46, %c0_47] : memref<128x128xf32, #tpu.memory_space<vmem>>, vector<128x128xf32>
    %cst_48 = arith.constant dense<0.000000e+00> : vector<32x128xf32>
    %51 = tpu.matmul %49, %50, %cst_48 {dimension_numbers = #tpu.dot_dimension_numbers<[1], [0], [0], [1], [0, 0, 1, 1], [], []>} : vector<32x128xf32>, vector<128x128xf32>, vector<32x128xf32> -> vector<32x128xf32>
    %c3_49 = arith.constant 3 : index
    %c0_50 = arith.constant 0 : index
    %c0_51 = arith.constant 0 : index
    %52 = vector.load %arg3[%c3_49, %c0_50, %c0_51] : memref<4x32x1xf32, #tpu.memory_space<vmem>>, vector<1x32x1xf32>
    %53 = vector.shape_cast %52 : vector<1x32x1xf32> to vector<32x1xf32>
    %54 = vector.broadcast %53 : vector<32x1xf32> to vector<32x128xf32>
    %55 = arith.addf %51, %54 : vector<32x128xf32>
    %cst_52 = arith.constant 0.000000e+00 : f32
    %56 = vector.broadcast %cst_52 : f32 to vector<32x128xf32>
    %57 = arith.cmpf oge, %55, %56 : vector<32x128xf32>
    %cst_53 = arith.constant 0.00999999977 : f32
    %58 = vector.broadcast %cst_53 : f32 to vector<32x128xf32>
    %59 = arith.mulf %58, %55 : vector<32x128xf32>
    %60 = arith.select %57, %55, %59 : vector<32x128xi1>, vector<32x128xf32>
    %c32_54 = arith.constant 32 : index
    %c0_55 = arith.constant 0 : index
    %61 = vector.load %arg7[%c32_54, %c0_55] : memref<128x128xf32, #tpu.memory_space<vmem>>, vector<32x128xf32>
    tpu.vector_store %arg7[%c32_54, %c0_55], %45 {strides = array<i32>} : memref<128x128xf32, #tpu.memory_space<vmem>>, vector<32x128xf32>,
    %c0_56 = arith.constant 0 : index
    %c0_57 = arith.constant 0 : index
    %62 = vector.load %arg7[%c0_56, %c0_57] : memref<128x128xf32, #tpu.memory_space<vmem>>, vector<32x128xf32>
    tpu.vector_store %arg7[%c0_56, %c0_57], %60 {strides = array<i32>} : memref<128x128xf32, #tpu.memory_space<vmem>>, vector<32x128xf32>,
    %c0_58 = arith.constant 0 : index
    %c0_59 = arith.constant 0 : index
    %63 = vector.load %arg7[%c0_58, %c0_59] : memref<128x128xf32, #tpu.memory_space<vmem>>, vector<128x128xf32>
    %c0_60 = arith.constant 0 : index
    %c0_61 = arith.constant 0 : index
    %64 = vector.load %arg4[%c0_60, %c0_61] : memref<128x1xf32, #tpu.memory_space<vmem>>, vector<128x1xf32>
    %65 = vector.broadcast %64 : vector<128x1xf32> to vector<128x128xf32>
    %66 = arith.mulf %63, %65 : vector<128x128xf32>
    %cst_62 = arith.constant dense<0.000000e+00> : vector<128xf32>
    %67 = vector.multi_reduction <add>, %66, %cst_62 [0] : vector<128x128xf32> to vector<128xf32>
    %68 = vector.shape_cast %67 : vector<128xf32> to vector<1x128xf32>
    %c0_63 = arith.constant 0 : index
    %c0_64 = arith.constant 0 : index
    %69 = vector.load %arg5[%c0_63, %c0_64] : memref<1x1xf32, #tpu.memory_space<vmem>>, vector<1x1xf32>
    %70 = vector.broadcast %69 : vector<1x1xf32> to vector<1x128xf32>
    %71 = arith.addf %68, %70 : vector<1x128xf32>
    %72 = math.tanh %71 : vector<1x128xf32>
    %cst_65 = arith.constant 1.000000e+00 : f32
    %73 = vector.broadcast %cst_65 : f32 to vector<1x128xf32>
    %74 = arith.addf %72, %73 : vector<1x128xf32>
    %cst_66 = arith.constant 5.000000e-01 : f32
    %75 = vector.broadcast %cst_66 : f32 to vector<1x128xf32>
    %76 = arith.mulf %74, %75 : vector<1x128xf32>
    %c0_67 = arith.constant 0 : index
    %c0_68 = arith.constant 0 : index
    %77 = vector.load %arg6[%c0_67, %c0_68] : memref<1x128xf32, #tpu.memory_space<vmem>>, vector<1x128xf32>
    tpu.vector_store %arg6[%c0_67, %c0_68], %76 {strides = array<i32>} : memref<1x128xf32, #tpu.memory_space<vmem>>, vector<1x128xf32>,
    return
  }
  func.func @transform_0(%arg0: i32) -> (i32, i32) {
    %c0_i32 = arith.constant 0 : i32
    %c0_i32_0 = arith.constant 0 : i32
    return %c0_i32, %arg0 : i32, i32
  }
  func.func @transform_1(%arg0: i32) -> (i32, i32, i32) {
    %c0_i32 = arith.constant 0 : i32
    %c0_i32_0 = arith.constant 0 : i32
    %c0_i32_1 = arith.constant 0 : i32
    %c0_i32_2 = arith.constant 0 : i32
    return %c0_i32, %c0_i32_0, %c0_i32_1 : i32, i32, i32
  }
  func.func @transform_2(%arg0: i32) -> (i32, i32, i32) {
    %c0_i32 = arith.constant 0 : i32
    %c0_i32_0 = arith.constant 0 : i32
    %c0_i32_1 = arith.constant 0 : i32
    %c0_i32_2 = arith.constant 0 : i32
    return %c0_i32, %c0_i32_0, %c0_i32_1 : i32, i32, i32
  }
  func.func @transform_3(%arg0: i32) -> (i32, i32) {
    %c0_i32 = arith.constant 0 : i32
    %c0_i32_0 = arith.constant 0 : i32
    %c0_i32_1 = arith.constant 0 : i32
    return %c0_i32, %c0_i32_0 : i32, i32
  }
  func.func @transform_4(%arg0: i32) -> (i32, i32) {
    %c0_i32 = arith.constant 0 : i32
    %c0_i32_0 = arith.constant 0 : i32
    %c0_i32_1 = arith.constant 0 : i32
    return %c0_i32, %c0_i32_0 : i32, i32
  }
  func.func @transform_5(%arg0: i32) -> (i32, i32) {
    %c0_i32 = arith.constant 0 : i32
    %c0_i32_0 = arith.constant 0 : i32
    return %c0_i32, %arg0 : i32, i32
  }
}

</mosaic_0001>

<bundles_post_ra>
// kernel: tpu_custom_call.1
= control target key start
LH: loop header
LB: loop body
LE: loop exit
PB: predicated region body
PF: predicated region fallthrough
CT: control target
= control target key end

     0   :  { %s1494_s0 = inlined_call_operand.vmem [shape: f32[2,128], index: 0, kind: input, shape index: {}]   ;;  %s1495_s1 = inlined_call_operand.vmem [shape: f32[4,32,128], index: 1, kind: input, shape index: {}]   ;;  %s1496_s2 = inlined_call_operand.vmem [shape: f32[4,32,1], index: 2, kind: input, shape index: {}]   ;;  %s1497_s3 = inlined_call_operand.vmem [shape: f32[128,1], index: 3, kind: input, shape index: {}]   ;;  %s1498_s4 = inlined_call_operand.<no memory space> [shape: f32[1,1], index: 4, kind: input, shape index: {}]   ;;  %s1499_s5 = inlined_call_operand.hbm [shape: f32[1,128], index: 5, kind: output, shape index: {}]  }
   0x1   :  { %v10_v0 = vstv %s1498_s4 }
   0x2   :  { %11 = vst [vmem:[#allocation3] sm:$0x1] %v10_v0 }
   0x3   :  { %v39_v1 = vld [vmem:[%s1494_s0] sm:$0x3]  ;;  %v1232_v3 = vmov 0.0   ;;  %v1233_v4 = vmov 0   ;;  %v63_v6 = vld [vmem:[%s1496_s2 + $0x10] sm:$0xff]  ;;  %v1234_v7 = vmov 0.0|0.0  }
   0x4   :  { %v41_v2 = vld [vmem:[%s1495_s1] sm:$0xff]  ;;  %31 = vst [vmem:[#allocation2 + $0x40] sm:$0xff] %v1232_v3  ;;  %1204 = vset.pattern.permute.xlu0 %v1233_v4  ;;  %1205 = vset.pattern.permute.xlu1 %v1233_v4  ;;  %v62_v8 = vld [vmem:[%s1496_s2 + $0x8] sm:$0xff]  ;;  %v64_v9 = vld [vmem:[%s1496_s2 + $0x18] sm:$0xff] }
   0x5   :  { %953 = vmatprep.mubr.f32.mxu0 %v41_v2  ;;  %v61_v5 = vld [vmem:[%s1496_s2] sm:$0xff]  ;;  %40 = vst [vmem:[#allocation2 + $0x40] sm:$0x3] %v39_v1  ;;  %1074 = vmatprep.subr.bf16.mxu0 %v1234_v7  ;;  %v822_v11 = vld [vmem:[%s1496_s2 + $0x28] sm:$0xff]  ;;  %v823_v13 = vld [vmem:[%s1496_s2 + $0x30] sm:$0xff] }
   0x6   :  { %67 = vperm.xlu0 %1204, %v61_v5   ;;  %77 = vperm.xlu1 %1205, %v63_v6   ;;  %v821_v10 = vld [vmem:[%s1496_s2 + $0x20] sm:$0xff]  ;;  %v824_v14 = vld [vmem:[%s1496_s2 + $0x38] sm:$0xff] }
   0x7   :  { %1076 = vmatpush3.bf16.msra.mxu0 %v1234_v7 }
   0x8   :  { %1078 = vmatprep.subr.bf16.mxu0 %v1234_v7 }
   0xa   :  { %72 = vperm.xlu0 %1204, %v62_v8   ;;  %82 = vperm.xlu1 %1205, %v64_v9  }
   0xb   :  { %1080 = vmatpush3.bf16.msra.mxu0 %v1234_v7 }
   0xc   :  { %1082 = vmatprep.subr.bf16.mxu0 %v1234_v7  ;;  %v1298_v12 = vld [vmem:[#allocation2 + $0x40] sm:$0xff] }
   0xd   :  { %v1309_v15 = vpack.c.bf16 %v1232_v3, %v1298_v12 }
   0xe   :  { %214 = vperm.xlu0 %1204, %v821_v10   ;;  %219 = vperm.xlu1 %1205, %v822_v11  }
   0xf   :  { %1084 = vmatpush3.bf16.msra.mxu0 %v1234_v7 }
  0x10   :  { %1086 = vmatprep.subr.bf16.mxu0 %v1234_v7 }
  0x11   :  { %12 = vsyncpa [#allocation5], 0  ;;  %v829_v16 = vld [vmem:[%s1496_s2 + $0x40] sm:$0xff]  ;;  %v830_v17 = vld [vmem:[%s1496_s2 + $0x48] sm:$0xff] }
  0x12   :  { %224 = vperm.xlu0 %1204, %v823_v13   ;;  %229 = vperm.xlu1 %1205, %v824_v14   ;;  %v831_v18 = vld [vmem:[%s1496_s2 + $0x50] sm:$0xff]  ;;  %v832_v19 = vld [vmem:[%s1496_s2 + $0x58] sm:$0xff]  ;;  %v837_v20 = vld [vmem:[%s1496_s2 + $0x60] sm:$0xff] }
  0x13   :  { %1088 = vmatpush3.bf16.msra.mxu0 %v1234_v7  ;;  %v838_v21 = vld [vmem:[%s1496_s2 + $0x68] sm:$0xff]  ;;  %v839_v22 = vld [vmem:[%s1496_s2 + $0x70] sm:$0xff]  ;;  %v840_v23 = vld [vmem:[%s1496_s2 + $0x78] sm:$0xff] }
  0x14   :  { %1090 = vmatprep.subr.bf16.mxu0 %v1309_v15  ;;  %v655_v24 = vld [vmem:[%s1497_s3] sm:$0xff]  ;;  %v42_v25 = vld [vmem:[%s1495_s1 + $0x8] sm:$0xff]  ;;  %v43_v27 = vld [vmem:[%s1495_s1 + $0x10] sm:$0xff] }
  0x15   :  { %v656_v26 = vld [vmem:[%s1497_s3 + $0x8] sm:$0xff]  ;;  %v657_v28 = vld [vmem:[%s1497_s3 + $0x10] sm:$0xff]  ;;  %v44_v29 = vld [vmem:[%s1495_s1 + $0x18] sm:$0xff] }
  0x16   :  { %365 = vperm.xlu0 %1204, %v829_v16   ;;  %370 = vperm.xlu1 %1205, %v830_v17   ;;  %v658_v30 = vld [vmem:[%s1497_s3 + $0x18] sm:$0xff]  ;;  %v659_v31 = vld [vmem:[%s1497_s3 + $0x20] sm:$0xff]  ;;  %v660_v32 = vld [vmem:[%s1497_s3 + $0x28] sm:$0xff] }
  0x17   :  { %1092 = vmatpush3.bf16.msra.mxu0 %v1309_v15  ;;  %v661_v33 = vld [vmem:[%s1497_s3 + $0x30] sm:$0xff]  ;;  %v662_v34 = vld [vmem:[%s1497_s3 + $0x38] sm:$0xff]  ;;  %v663_v35 = vld [vmem:[%s1497_s3 + $0x40] sm:$0xff] }
  0x18   :  { %1094 = vmatprep.subr.bf16.mxu0 %v1234_v7  ;;  %v664_v36 = vld [vmem:[%s1497_s3 + $0x48] sm:$0xff]  ;;  %v665_v37 = vld [vmem:[%s1497_s3 + $0x50] sm:$0xff]  ;;  %v666_v38 = vld [vmem:[%s1497_s3 + $0x58] sm:$0xff] }
  0x19   :  { %v667_v39 = vld [vmem:[%s1497_s3 + $0x60] sm:$0xff]  ;;  %v668_v40 = vld [vmem:[%s1497_s3 + $0x68] sm:$0xff]  ;;  %v669_v41 = vld [vmem:[%s1497_s3 + $0x70] sm:$0xff] }
  0x1a   :  { %375 = vperm.xlu0 %1204, %v831_v18   ;;  %380 = vperm.xlu1 %1205, %v832_v19   ;;  %v670_v42 = vld [vmem:[%s1497_s3 + $0x78] sm:$0xff]  ;;  %v788_v43 = vld [vmem:[#allocation3] sm:$0x1]  ;;  %v818_v3 = vld [vmem:[%s1495_s1 + $0x28] sm:$0xff] }
  0x1b   :  { %1096 = vmatpush3.bf16.msra.mxu0 %v1234_v7  ;;  %v817_v44 = vld [vmem:[%s1495_s1 + $0x20] sm:$0xff]  ;;  %v819_v4 = vld [vmem:[%s1495_s1 + $0x30] sm:$0xff]  ;;  %v820_v5 = vld [vmem:[%s1495_s1 + $0x38] sm:$0xff] }
  0x1c   :  { %1098 = vmatprep.subr.bf16.mxu0 %v1234_v7  ;;  %991 = vmatprep.mubr.f32.mxu1 %v817_v44  ;;  %v825_v6 = vld [vmem:[%s1495_s1 + $0x40] sm:$0xff] }
  0x1e   :  { %516 = vperm.xlu0 %1204, %v837_v20   ;;  %521 = vperm.xlu1 %1205, %v838_v21  }
  0x1f   :  { %1100 = vmatpush3.bf16.msra.mxu0 %v1234_v7 }
  0x20   :  { %1102 = vmatprep.subr.bf16.mxu0 %v1234_v7 }
  0x22   :  { %526 = vperm.xlu0 %1204, %v839_v22   ;;  %531 = vperm.xlu1 %1205, %v840_v23  }
  0x23   :  { %1104 = vmatpush3.bf16.msra.mxu0 %v1234_v7 }
  0x26   :  { %673 = vperm.xlu0 %1204, %v655_v24   ;;  %954 = vmatmul.mubr.f32.vlgmr.msra.gmra.mrb[0].mxu0 %v42_v25 }
  0x27   :  { %678 = vperm.xlu1 %1205, %v656_v26   ;;  %956 = vmatprep.mubr.f32.mxu0 %v43_v27 }
  0x2a   :  { %683 = vperm.xlu0 %1204, %v657_v28   ;;  %957 = vmatmul.mubr.f32.gmra.mrb[2].mxu0 %v44_v29 }
  0x2b   :  { %688 = vperm.xlu1 %1205, %v658_v30   ;;  %1029 = vmatprep.mubr.f32.mxu0 %v825_v6 }
  0x2e   :  { %693 = vperm.xlu0 %1204, %v659_v31  }
  0x2f   :  { %698 = vperm.xlu1 %1205, %v660_v32   ;;  %v826_v32 = vld [vmem:[%s1495_s1 + $0x48] sm:$0xff] }
  0x32   :  { %703 = vperm.xlu0 %1204, %v661_v33   ;;  %v827_v33 = vld [vmem:[%s1495_s1 + $0x50] sm:$0xff] }
  0x33   :  { %708 = vperm.xlu1 %1205, %v662_v34   ;;  %v828_v34 = vld [vmem:[%s1495_s1 + $0x58] sm:$0xff] }
  0x36   :  { %713 = vperm.xlu0 %1204, %v663_v35   ;;  %v833_v35 = vld [vmem:[%s1495_s1 + $0x60] sm:$0xff] }
  0x37   :  { %718 = vperm.xlu1 %1205, %v664_v36  }
  0x3a   :  { %723 = vperm.xlu0 %1204, %v665_v37  }
  0x3b   :  { %728 = vperm.xlu1 %1205, %v666_v38  }
  0x3e   :  { %733 = vperm.xlu0 %1204, %v667_v39  }
  0x3f   :  { %738 = vperm.xlu1 %1205, %v668_v40  }
  0x42   :  { %743 = vperm.xlu0 %1204, %v669_v41  }
  0x43   :  { %748 = vperm.xlu1 %1205, %v670_v42  }
  0x46   :  { %791 = vperm.xlu0 %1204, %v788_v43  }
  0x85   :  { %v68_v45 = vpop.permute.xlu0 %67  ;;  %v78_v46 = vpop.permute.xlu1 %77 }
  0x89   :  { %v73_v47 = vpop.permute.xlu0 %72  ;;  %v83_v53 = vpop.permute.xlu1 %82 }
  0x8d   :  { %v220_v8 = vpop.permute.xlu1 %219  ;;  %v215_v9 = vpop.permute.xlu0 %214 }
  0x91   :  { %v230_v17 = vpop.permute.xlu1 %229  ;;  %v225_v20 = vpop.permute.xlu0 %224 }
  0x95   :  { %v371_v36 = vpop.permute.xlu1 %370  ;;  %v366_v37 = vpop.permute.xlu0 %365 }
  0x99   :  { %v381_v43 = vpop.permute.xlu1 %380 }
  0xf9   :  { %v955_v48 = vpop.f32.mrb[0].mxu0 }
  0xfa   :  { %v157_v49 = vadd.f32 %v955_v48, %v73_v47  ;;  %v151_v50 = vpop.f32.mrb[1].mxu0 }
  0xfb   :  { %v152_v51 = vadd.f32 %v151_v50, %v68_v45 }
  0xfc   :  { %vm171_vm0 = vcmp.ge.f32.partialorder %v157_v49, 0.0  ;;  %v175_v52 = vmul.f32 0.01, %v157_v49 }
  0xfd   :  { %vm170_vm1 = vcmp.ge.f32.partialorder %v152_v51, 0.0  ;;  %v174_v54 = vmul.f32 0.01, %v152_v51  ;;  %v958_v55 = vpop.f32.mrb[2].mxu0 }
  0xfe   :  { %v179_v56 = vsel %vm171_vm0, %v157_v49, %v175_v52  ;;  %v167_v57 = vadd.f32 %v958_v55, %v83_v53  ;;  %v161_v58 = vpop.f32.mrb[3].mxu0 }
  0xff   :  { %v178_v59 = vsel %vm170_vm1, %v152_v51, %v174_v54  ;;  %v162_v60 = vadd.f32 %v161_v58, %v78_v46  ;;  %v376_v46 = vpop.permute.xlu0 %375  ;;  %v834_v58 = vld [vmem:[%s1495_s1 + $0x68] sm:$0xff] }
 0x100   :  { %vm173_vm2 = vcmp.ge.f32.partialorder %v167_v57, 0.0  ;;  %v177_v61 = vmul.f32 0.01, %v167_v57  ;;  %v1105_v62 = vpack.c.bf16 %v179_v56, %v178_v59  ;;  %v836_v59 = vld [vmem:[%s1495_s1 + $0x78] sm:$0xff] }
 0x101   :  { %vm172_vm3 = vcmp.ge.f32.partialorder %v162_v60, 0.0  ;;  %v176_v63 = vmul.f32 0.01, %v162_v60 }
 0x102   :  { %v181_v0 = vsel %vm173_vm2, %v167_v57, %v177_v61  ;;  %1106 = vmatprep.subr.bf16.mxu1 %v1105_v62  ;;  %v522_v61 = vpop.permute.xlu1 %521 }
 0x103   :  { %v180_v1 = vsel %vm172_vm3, %v162_v60, %v176_v63  ;;  %1108 = vmatpush3.bf16.msra.mxu1 %v1105_v62  ;;  %v517_v60 = vpop.permute.xlu0 %516 }
 0x104   :  { %v1109_v2 = vpack.c.bf16 %v181_v0, %v180_v1 }
 0x106   :  { %1110 = vmatprep.subr.bf16.mxu1 %v1109_v2  ;;  %v532_v63 = vpop.permute.xlu1 %531 }
 0x107   :  { %1112 = vmatpush3.bf16.msra.mxu1 %v1109_v2 }
 0x108   :  { %1114 = vmatprep.subr.bf16.mxu1 %v1234_v7 }
 0x10a   :  { %v679_v0 = vpop.permute.xlu1 %678 }
 0x10b   :  { %1116 = vmatpush3.bf16.msra.mxu1 %v1234_v7 }
 0x10c   :  { %1118 = vmatprep.subr.bf16.mxu1 %v1234_v7 }
 0x10f   :  { %1120 = vmatpush3.bf16.msra.mxu1 %v1234_v7 }
 0x110   :  { %1122 = vmatprep.subr.bf16.mxu1 %v1309_v15 }
 0x113   :  { %1124 = vmatpush3.bf16.msra.mxu1 %v1309_v15 }
 0x114   :  { %1126 = vmatprep.subr.bf16.mxu1 %v1234_v7 }
 0x117   :  { %1128 = vmatpush3.bf16.msra.mxu1 %v1234_v7 }
 0x118   :  { %1130 = vmatprep.subr.bf16.mxu1 %v1234_v7 }
 0x11b   :  { %1132 = vmatpush3.bf16.msra.mxu1 %v1234_v7 }
 0x11c   :  { %1134 = vmatprep.subr.bf16.mxu1 %v1234_v7 }
 0x11f   :  { %1136 = vmatpush3.bf16.msra.mxu1 %v1234_v7 }
 0x122   :  { %992 = vmatmul.mubr.f32.vlgmr.msra.gmra.mrb[0].mxu1 %v818_v3 }
 0x123   :  { %994 = vmatprep.mubr.f32.mxu1 %v819_v4 }
 0x126   :  { %995 = vmatmul.mubr.f32.gmra.mrb[2].mxu1 %v820_v5 }
 0x127   :  { %1067 = vmatprep.mubr.f32.mxu1 %v833_v35 }
 0x1f5   :  { %v993_v10 = vpop.f32.mrb[0].mxu1 }
 0x1f6   :  { %v304_v11 = vadd.f32 %v993_v10, %v220_v8  ;;  %v298_v13 = vpop.f32.mrb[1].mxu1 }
 0x1f7   :  { %v299_v14 = vadd.f32 %v298_v13, %v215_v9 }
 0x1f8   :  { %vm318_vm4 = vcmp.ge.f32.partialorder %v304_v11, 0.0  ;;  %v322_v16 = vmul.f32 0.01, %v304_v11 }
 0x1f9   :  { %vm317_vm5 = vcmp.ge.f32.partialorder %v299_v14, 0.0  ;;  %v321_v18 = vmul.f32 0.01, %v299_v14  ;;  %v996_v19 = vpop.f32.mrb[2].mxu1 }
 0x1fa   :  { %v326_v21 = vsel %vm318_vm4, %v304_v11, %v322_v16  ;;  %v314_v22 = vadd.f32 %v996_v19, %v230_v17  ;;  %v308_v23 = vpop.f32.mrb[3].mxu1 }
 0x1fb   :  { %v325_v24 = vsel %vm317_vm5, %v299_v14, %v321_v18  ;;  %v309_v25 = vadd.f32 %v308_v23, %v225_v20 }
 0x1fc   :  { %vm320_vm6 = vcmp.ge.f32.partialorder %v314_v22, 0.0  ;;  %v324_v26 = vmul.f32 0.01, %v314_v22  ;;  %v1137_v27 = vpack.c.bf16 %v326_v21, %v325_v24 }
 0x1fd   :  { %vm319_vm7 = vcmp.ge.f32.partialorder %v309_v25, 0.0  ;;  %v323_v28 = vmul.f32 0.01, %v309_v25 }
 0x1fe   :  { %v328_v29 = vsel %vm320_vm6, %v314_v22, %v324_v26  ;;  %1138 = vmatprep.subr.bf16.mxu0 %v1137_v27 }
 0x1ff   :  { %v327_v30 = vsel %vm319_vm7, %v309_v25, %v323_v28  ;;  %1140 = vmatpush3.bf16.msra.mxu0 %v1137_v27 }
 0x200   :  { %v1141_v31 = vpack.c.bf16 %v328_v29, %v327_v30 }
 0x202   :  { %1142 = vmatprep.subr.bf16.mxu0 %v1141_v31 }
 0x203   :  { %1144 = vmatpush3.bf16.msra.mxu0 %v1141_v31 }
 0x204   :  { %1146 = vmatprep.subr.bf16.mxu0 %v1105_v62 }
 0x207   :  { %1148 = vmatpush3.bf16.msra.mxu0 %v1105_v62  ;;  %v527_v62 = vpop.permute.xlu0 %526 }
 0x208   :  { %1150 = vmatprep.subr.bf16.mxu0 %v1109_v2 }
 0x20b   :  { %1152 = vmatpush3.bf16.msra.mxu0 %v1109_v2  ;;  %v689_v2 = vpop.permute.xlu1 %688 }
 0x20c   :  { %1154 = vmatprep.subr.bf16.mxu0 %v1309_v15 }
 0x20f   :  { %1156 = vmatpush3.bf16.msra.mxu0 %v1309_v15  ;;  %v699_v10 = vpop.permute.xlu1 %698 }
 0x210   :  { %1158 = vmatprep.subr.bf16.mxu0 %v1234_v7 }
 0x213   :  { %1160 = vmatpush3.bf16.msra.mxu0 %v1234_v7 }
 0x214   :  { %1162 = vmatprep.subr.bf16.mxu0 %v1234_v7 }
 0x217   :  { %1164 = vmatpush3.bf16.msra.mxu0 %v1234_v7 }
 0x218   :  { %1166 = vmatprep.subr.bf16.mxu0 %v1234_v7 }
 0x21b   :  { %1168 = vmatpush3.bf16.msra.mxu0 %v1234_v7 }
 0x21e   :  { %1030 = vmatmul.mubr.f32.vlgmr.msra.gmra.mrb[4].mxu0 %v826_v32 }
 0x21f   :  { %1032 = vmatprep.mubr.f32.mxu0 %v827_v33 }
 0x222   :  { %1033 = vmatmul.mubr.f32.gmra.mrb[6].mxu0 %v828_v34 }
 0x2f1   :  { %v1031_v38 = vpop.f32.mrb[4].mxu0 }
 0x2f2   :  { %v455_v39 = vadd.f32 %v1031_v38, %v371_v36  ;;  %v449_v40 = vpop.f32.mrb[5].mxu0 }
 0x2f3   :  { %v450_v41 = vadd.f32 %v449_v40, %v366_v37 }
 0x2f4   :  { %vm469_vm8 = vcmp.ge.f32.partialorder %v455_v39, 0.0  ;;  %v473_v42 = vmul.f32 0.01, %v455_v39 }
 0x2f5   :  { %vm468_vm9 = vcmp.ge.f32.partialorder %v450_v41, 0.0  ;;  %v472_v44 = vmul.f32 0.01, %v450_v41  ;;  %v1034_v45 = vpop.f32.mrb[6].mxu0 }
 0x2f6   :  { %v1448_v47 = vsel %vm469_vm8, %v455_v39, %v473_v42  ;;  %v465_v48 = vadd.f32 %v1034_v45, %v381_v43  ;;  %v459_v49 = vpop.f32.mrb[7].mxu0 }
 0x2f7   :  { %v1450_v50 = vsel %vm468_vm9, %v450_v41, %v472_v44  ;;  %v460_v51 = vadd.f32 %v459_v49, %v376_v46  ;;  %v756_v36 = vmul.f32 %v699_v10, %v1448_v47 }
 0x2f8   :  { %vm471_vm10 = vcmp.ge.f32.partialorder %v465_v48, 0.0  ;;  %v475_v52 = vmul.f32 0.01, %v465_v48  ;;  %v1169_v53 = vpack.c.bf16 %v1448_v47, %v1450_v50 }
 0x2f9   :  { %vm470_vm11 = vcmp.ge.f32.partialorder %v460_v51, 0.0  ;;  %v474_v54 = vmul.f32 0.01, %v460_v51 }
 0x2fa   :  { %v1454_v55 = vsel %vm471_vm10, %v465_v48, %v475_v52  ;;  %1170 = vmatprep.subr.bf16.mxu1 %v1169_v53 }
 0x2fb   :  { %v1456_v56 = vsel %vm470_vm11, %v460_v51, %v474_v54  ;;  %1172 = vmatpush3.bf16.msra.mxu1 %v1169_v53 }
 0x2fc   :  { %v1173_v57 = vpack.c.bf16 %v1454_v55, %v1456_v56 }
 0x2fe   :  { %1174 = vmatprep.subr.bf16.mxu1 %v1173_v57 }
 0x2ff   :  { %1176 = vmatpush3.bf16.msra.mxu1 %v1173_v57 }
 0x300   :  { %1178 = vmatprep.subr.bf16.mxu1 %v1137_v27 }
 0x303   :  { %1180 = vmatpush3.bf16.msra.mxu1 %v1137_v27  ;;  %v709_v27 = vpop.permute.xlu1 %708 }
 0x304   :  { %1182 = vmatprep.subr.bf16.mxu1 %v1141_v31  ;;  %v758_v40 = vmul.f32 %v709_v27, %v1454_v55 }
 0x307   :  { %1184 = vmatpush3.bf16.msra.mxu1 %v1141_v31  ;;  %v719_v35 = vpop.permute.xlu1 %718 }
 0x308   :  { %1186 = vmatprep.subr.bf16.mxu1 %v1309_v15  ;;  %v760_v46 = vmul.f32 0.0, %v719_v35 }
 0x30b   :  { %1188 = vmatpush3.bf16.msra.mxu1 %v1309_v15  ;;  %v835_v15 = vld [vmem:[%s1495_s1 + $0x70] sm:$0xff]  ;;  %v729_v43 = vpop.permute.xlu1 %728  ;;  %s1235_s1 = smov [#allocation4]  }
 0x30c   :  { %1190 = vmatprep.subr.bf16.mxu1 %v1234_v7  ;;  %v762_v53 = vmul.f32 0.0, %v729_v43  ;;  %s809_s7 = sshll.u32 %s1235_s1, 4  ;;  %s810_s7 = int_to_ptr.vmem [resolvable:$true] %s809_s7 }
 0x30d   :  { %s1208_s8 = scalar_lea.vmem %s810_s7, 16  ;;  %s1212_s2 = scalar_lea.vmem %s810_s7, 32 }
 0x30e   :  { %p1209_p0 = scmp.ne.s32.totalorder %s810_s7, %s1208_s8  ;;  %p1213_p1 = scmp.lt.s32.totalorder %s810_s7, %s810_s7 }
 0x30f   :  { %1192 = vmatpush3.bf16.msra.mxu1 %v1234_v7  ;;  %v739_v52 = vpop.permute.xlu1 %738  ;;  %p1214_p2 = scmp.lt.s32.totalorder %s1212_s2, %s1208_s8 }
 0x310   :  { %1194 = vmatprep.subr.bf16.mxu1 %v1234_v7 }
 0x311   :  { %p1215_p3 = por %p1214_p2, %p1213_p1 }
 0x313   :  { %1196 = vmatpush3.bf16.msra.mxu1 %v1234_v7  ;;  %v749_v55 = vpop.permute.xlu1 %748  ;;  %p1216_p4 = pnand %p1215_p3, %p1209_p0 }
 0x314   :  { %1198 = vmatprep.subr.bf16.mxu1 %v1234_v7 }
 0x317   :  { %1200 = vmatpush3.bf16.msra.mxu1 %v1234_v7  ;;  %v674_v7 = vpop.permute.xlu0 %673 }
 0x31a   :  { %1068 = vmatmul.mubr.f32.vlgmr.msra.gmra.mrb[4].mxu1 %v834_v58 }
 0x31b   :  { %1070 = vmatprep.mubr.f32.mxu1 %v835_v15  ;;  %v684_v1 = vpop.permute.xlu0 %683 }
 0x31e   :  { %1071 = vmatmul.mubr.f32.gmra.mrb[6].mxu1 %v836_v59 }
 0x31f   :  { %v694_v8 = vpop.permute.xlu0 %693 }
 0x320   :  { %v755_v32 = vmul.f32 %v694_v8, %v1450_v50 }
 0x323   :  { %v704_v26 = vpop.permute.xlu0 %703 }
 0x324   :  { %v757_v38 = vmul.f32 %v704_v26, %v1456_v56  ;;  %v764_v56 = vmul.f32 0.0, %v739_v52 }
 0x327   :  { %v714_v34 = vpop.permute.xlu0 %713 }
 0x328   :  { %v759_v44 = vmul.f32 %v714_v34, %v1298_v12  ;;  %v794_v12 = vlaneseq }
 0x32b   :  { %v724_v42 = vpop.permute.xlu0 %723 }
 0x32c   :  { %v761_v49 = vmul.f32 0.0, %v724_v42 }
 0x32f   :  { %v734_v51 = vpop.permute.xlu0 %733 }
 0x330   :  { %v763_v54 = vmul.f32 0.0, %v734_v51 }
 0x333   :  { %v744_v15 = vpop.permute.xlu0 %743 }
 0x334   :  { %v765_v59 = vmul.f32 0.0, %v744_v15 }
 0x3ed   :  { %v1069_v3 = vpop.f32.mrb[4].mxu1 }
 0x3ee   :  { %v606_v4 = vadd.f32 %v1069_v3, %v522_v61  ;;  %v600_v5 = vpop.f32.mrb[5].mxu1  ;;  %v766_v61 = vmul.f32 0.0, %v749_v55 }
 0x3ef   :  { %v601_v6 = vadd.f32 %v600_v5, %v517_v60  ;;  %v792_v5 = vpop.permute.xlu0 %791 }
 0x3f0   :  { %vm620_vm12 = vcmp.ge.f32.partialorder %v606_v4, 0.0  ;;  %v624_v9 = vmul.f32 0.01, %v606_v4 }
 0x3f1   :  { %vm619_vm13 = vcmp.ge.f32.partialorder %v601_v6, 0.0  ;;  %v623_v11 = vmul.f32 0.01, %v601_v6  ;;  %v1072_v13 = vpop.f32.mrb[6].mxu1 }
 0x3f2   :  { %v628_v14 = vsel %vm620_vm12, %v606_v4, %v624_v9  ;;  %v616_v16 = vadd.f32 %v1072_v13, %v532_v63  ;;  %v610_v17 = vpop.f32.mrb[7].mxu1 }
 0x3f3   :  { %v752_v18 = vmul.f32 %v679_v0, %v628_v14  ;;  %v627_v19 = vsel %vm619_vm13, %v601_v6, %v623_v11  ;;  %v611_v20 = vadd.f32 %v610_v17, %v527_v62  ;;  %v795_v0 = vshrl.u32 %v794_v12, 7 }
 0x3f4   :  { %v751_v21 = vmul.f32 %v674_v7, %v627_v19  ;;  %vm622_vm14 = vcmp.ge.f32.partialorder %v616_v16, 0.0  ;;  %v626_v22 = vmul.f32 0.01, %v616_v16 }
 0x3f5   :  { %vm621_vm15 = vcmp.ge.f32.partialorder %v611_v20, 0.0  ;;  %v625_v23 = vmul.f32 0.01, %v611_v20  ;;  %v796_v3 = vsub.s32 0, %v795_v0 }
 0x3f6   :  { %v630_v24 = vsel %vm622_vm14, %v616_v16, %v626_v22  ;;  %v767_v25 = vadd.f32 %v752_v18, %v751_v21 }
 0x3f7   :  { %v629_v28 = vsel %vm621_vm15, %v611_v20, %v625_v23  ;;  %v754_v30 = vmul.f32 %v689_v2, %v630_v24  ;;  %v797_v8 = vrot.slane %v792_v5, %v796_v3 }
 0x3f8   :  { %v753_v29 = vmul.f32 %v684_v1, %v629_v28 }
 0x3fa   :  { %v768_v31 = vadd.f32 %v767_v25, %v753_v29 }
 0x3fc   :  { %v769_v33 = vadd.f32 %v768_v31, %v754_v30 }
 0x3fe   :  { %v770_v37 = vadd.f32 %v769_v33, %v755_v32 }
 0x400   :  { %v771_v39 = vadd.f32 %v770_v37, %v756_v36 }
 0x402   :  { %v772_v41 = vadd.f32 %v771_v39, %v757_v38 }
 0x404   :  { %v773_v45 = vadd.f32 %v772_v41, %v758_v40 }
 0x406   :  { %v774_v48 = vadd.f32 %v773_v45, %v759_v44 }
 0x408   :  { %v775_v50 = vadd.f32 %v774_v48, %v760_v46 }
 0x40a   :  { %v776_v47 = vadd.f32 %v775_v50, %v761_v49 }
 0x40c   :  { %v777_v57 = vadd.f32 %v776_v47, %v762_v53 }
 0x40e   :  { %v778_v58 = vadd.f32 %v777_v57, %v763_v54 }
 0x410   :  { %v779_v60 = vadd.f32 %v778_v58, %v764_v56 }
 0x412   :  { %v780_v62 = vadd.f32 %v779_v60, %v765_v59 }
 0x414   :  { %v781_v63 = vadd.f32 %v780_v62, %v766_v61 }
 0x416   :  { %v782_v7 = vrot.slane %v781_v63, 4 }
 0x418   :  { %v783_v1 = vadd.f32 %v782_v7, %v781_v63 }
 0x41a   :  { %v784_v2 = vrot.slane %v783_v1, 2 }
 0x41c   :  { %v785_v4 = vadd.f32 %v784_v2, %v783_v1 }
 0x41e   :  { %v786_v6 = vrot.slane %v785_v4, 1 }
 0x420   :  { %v787_v9 = vadd.f32 %v786_v6, %v785_v4 }
 0x422   :  { %v798_v10 = vadd.f32 %v797_v8, %v787_v9 }
 0x424   :  { %1206 = vtanh.f32 %v798_v10 }
 0x42e   :  { %v1207_v11 = vpop.eup %1206 }
 0x42f   :  { %v800_v13 = vadd.f32 1.0, %v1207_v11 }
 0x431   :  { %v801_v14 = vmul.f32 0.5, %v800_v13 }
 0x433   :  { %802 = vst [vmem:[#allocation4] sm:$0x1] %v801_v14 }
 0x434   :  { %1219 = shalt.err (!%p1216_p4)
}
 0x435   :  { %s1220_s11 = scalar_lea.hbm %s1499_s5, 16 }
 0x436   :  { %p1221_p5 = scmp.ne.s32.totalorder %s1499_s5, %s1220_s11  ;;  %p1224_p6 = scmp.lt.u32.totalorder %s1220_s11, %s1499_s5 }
 0x438   :  { %p1226_p7 = pnand %p1224_p6, %p1221_p5 }
 0x43a   :  { %1229 = shalt.err (!%p1226_p7)
}
 0x43b   :  { %812 = dma.vmem_to_hbm [thread:$0]  %s810_s7, 16, %s1499_s5, [#allocation5]  }
 0x43c   :  { %1230 = dma.done.wait [#allocation5], 16  }
 0x43d   :  { %1231 = vsyncadd [#allocation5], 4294967280 }
 0x43e   :  { %816 = vsyncpa [#allocation5], 1 }

</bundles_post_ra>
